<compile_context>
chip_gen: v7x
topology: tpu7x:2x2x1
jax: 0.10.0
libtpu: 0.0.40
codegen_flags: <defaults>
</compile_context>

<pallas_src>
import math

import jax
import jax.numpy as jnp
from jax.experimental import pallas as pl
from jax.experimental.pallas import tpu as pltpu  # noqa: F401

# ---- model hyper-parameters (small, consistent with the module) ----
B = 2        # batch
S = 8        # sequence length
D = 32       # model size (EncoderLayer.size)
H = 4        # attention heads
DK = D // H  # per-head dim
DFF = 64     # feed-forward hidden size
EPS = 1e-6   # LayerNorm eps (added to std, matching the PyTorch code)


def _layer_norm(x, a, b):
    """Matches the PyTorch LayerNorm: unbiased std (N-1), eps added to std."""
    mean = jnp.mean(x, axis=-1, keepdims=True)
    var = jnp.sum((x - mean) ** 2, axis=-1, keepdims=True) * (1.0 / (x.shape[-1] - 1))
    inv = pl.reciprocal(jnp.sqrt(var) + EPS, approx=False)  # precise: keeps f32 accuracy
    return a * (x - mean) * inv + b


def encoder_layer_kernel(
    x_ref, bias_ref,
    a1_ref, b1_ref,                       # LayerNorm 1 (before attention)
    wqkv_ref, bqkv_ref, wo_ref, bo_ref,   # fused QKV + output projection
    a2_ref, b2_ref,                       # LayerNorm 2 (before FFN)
    w1_ref, bf1_ref, w2_ref, bf2_ref,     # feed-forward
    out_ref,
):
    x = x_ref[...].reshape(B * S, D)      # (16, 32): all tokens as one row block
    bias = bias_ref[...]                  # (B, S, S) additive attention bias

    # ---------- sublayer 0: pre-norm self-attention + residual ----------
    xn = _layer_norm(x, a1_ref[...], b1_ref[...])

    # Single fused QKV projection (scale already folded into the Q columns).
    qkv = jnp.dot(xn, wqkv_ref[...], preferred_element_type=jnp.float32) + bqkv_ref[...]
    q = qkv[:, 0 * D:1 * D].reshape(B, S, D)
    k = qkv[:, 1 * D:2 * D].reshape(B, S, D)
    v = qkv[:, 2 * D:3 * D].reshape(B, S, D)

    head_ctx = []
    for h in range(H):                    # static unroll; each einsum is batched over B
        sl = slice(h * DK, (h + 1) * DK)
        qh, kh, vh = q[:, :, sl], k[:, :, sl], v[:, :, sl]
        s = jnp.einsum("bqd,bkd->bqk", qh, kh,
                       preferred_element_type=jnp.float32) + bias
        s = s - jnp.max(s, axis=-1, keepdims=True)
        p = jnp.exp(s)
        p = p * pl.reciprocal(jnp.sum(p, axis=-1, keepdims=True), approx=True)
        head_ctx.append(jnp.einsum("bqk,bkd->bqd", p, vh,
                                   preferred_element_type=jnp.float32))

    ctx = jnp.concatenate(head_ctx, axis=-1).reshape(B * S, D)
    attn = jnp.dot(ctx, wo_ref[...], preferred_element_type=jnp.float32) + bo_ref[...]
    x1 = x + attn                         # residual (dropout = identity)

    # ---------- sublayer 1: pre-norm feed-forward + residual ----------
    xn2 = _layer_norm(x1, a2_ref[...], b2_ref[...])
    hdn = jnp.dot(xn2, w1_ref[...], preferred_element_type=jnp.float32) + bf1_ref[...]
    hdn = jnp.maximum(hdn, 0.0)           # ReLU
    ff = jnp.dot(hdn, w2_ref[...], preferred_element_type=jnp.float32) + bf2_ref[...]

    out_ref[...] = (x1 + ff).reshape(B, S, D)


@jax.jit
def encoder_layer(x, mask, params):
    """x: (B, S, D) f32, mask: (B, S, S) f32 (0 => masked key position)."""
    (a1, b1, wq, bq, wk, bk, wv, bv, wo, bo, a2, b2, w1, bf1, w2, bf2) = params

    scale = 1.0 / math.sqrt(DK)
    # Fuse Q/K/V projections into one matmul; fold the attention scale into Q.
    wqkv = jnp.concatenate([wq * scale, wk, wv], axis=1)   # (D, 3D)
    bqkv = jnp.concatenate([bq * scale, bk, bv], axis=1)   # (1, 3D)
    # Additive attention bias (0 keep / -1e9 masked), computed once wrapper-side.
    bias = jnp.where(mask == 0.0, jnp.float32(-1e9), jnp.float32(0.0))

    # Gridless call: every operand fits comfortably in VMEM on v5e/v6e/v7x, so the
    # kernel runs once with whole-array refs (no per-step pipeline machinery).
    return pl.pallas_call(
        encoder_layer_kernel,
        out_shape=jax.ShapeDtypeStruct((B, S, D), jnp.float32),
    )(x, bias, a1, b1, wqkv, bqkv, wo, bo, a2, b2, w1, bf1, w2, bf2)


# ---------------- pure-JAX reference (for correctness check) ----------------
def encoder_layer_ref(x, mask, params):
    (a1, b1, wq, bq, wk, bk, wv, bv, wo, bo, a2, b2, w1, bf1, w2, bf2) = params

    def ln(x, a, b):
        mean = jnp.mean(x, axis=-1, keepdims=True)
        var = jnp.sum((x - mean) ** 2, axis=-1, keepdims=True) / (x.shape[-1] - 1)
        return a * (x - mean) / (jnp.sqrt(var) + EPS) + b

    xn = ln(x, a1, b1)
    q = xn @ wq + bq
    k = xn @ wk + bk
    v = xn @ wv + bv
    q = q.reshape(B, S, H, DK).transpose(0, 2, 1, 3)
    k = k.reshape(B, S, H, DK).transpose(0, 2, 1, 3)
    v = v.reshape(B, S, H, DK).transpose(0, 2, 1, 3)
    scores = jnp.einsum("bhqd,bhkd->bhqk", q, k) / math.sqrt(DK)
    scores = jnp.where(mask[:, None, :, :] == 0.0, -1e9, scores)
    p = jax.nn.softmax(scores, axis=-1)
    attn = jnp.einsum("bhqk,bhkd->bhqd", p, v).transpose(0, 2, 1, 3).reshape(B, S, D)
    x1 = x + (attn @ wo + bo)
    xn2 = ln(x1, a2, b2)
    ff = jnp.maximum(xn2 @ w1 + bf1, 0.0) @ w2 + bf2
    return x1 + ff


if __name__ == "__main__":
    key = jax.random.PRNGKey(0)
    keys = jax.random.split(key, 10)

    x = jax.random.normal(keys[0], (B, S, D), dtype=jnp.float32)
    # padding-style mask: last 2 key positions masked out for every query
    mask = jnp.ones((B, S, S), dtype=jnp.float32)
    mask = mask.at[:, :, -2:].set(0.0)

    def init_w(k, shape, scale=0.1):
        return (scale * jax.random.normal(k, shape)).astype(jnp.float32)

    params = (
        jnp.ones((1, D), jnp.float32),            # a1
        jnp.zeros((1, D), jnp.float32),           # b1
        init_w(keys[1], (D, D)), jnp.zeros((1, D), jnp.float32),      # wq, bq
        init_w(keys[2], (D, D)), jnp.zeros((1, D), jnp.float32),      # wk, bk
        init_w(keys[3], (D, D)), jnp.zeros((1, D), jnp.float32),      # wv, bv
        init_w(keys[4], (D, D)), jnp.zeros((1, D), jnp.float32),      # wo, bo
        jnp.ones((1, D), jnp.float32),            # a2
        jnp.zeros((1, D), jnp.float32),           # b2
        init_w(keys[5], (D, DFF)), jnp.zeros((1, DFF), jnp.float32),  # w1, bf1
        init_w(keys[6], (DFF, D)), jnp.zeros((1, D), jnp.float32),    # w2, bf2
    )

    out = encoder_layer(x, mask, params)
    out = jax.block_until_ready(out)

    ref = encoder_layer_ref(x, mask, params)
    assert out.shape == (B, S, D)
    # Tolerance accounts for the approximate (EUP) reciprocal in the softmax denominator.
    assert jnp.allclose(out, ref, atol=5e-3, rtol=5e-3), "mismatch vs JAX reference"

    print("KERNEL_OK")
</pallas_src>

<mosaic_0001>
module attributes {stable_mosaic.version = 11 : i64} {
  func.func @encoder_layer_kernel(%arg0: memref<2x8x32xf32, #tpu.memory_space<vmem>>, %arg1: memref<2x8x8xf32, #tpu.memory_space<vmem>>, %arg2: memref<1x32xf32, #tpu.memory_space<vmem>>, %arg3: memref<1x32xf32, #tpu.memory_space<vmem>>, %arg4: memref<32x96xf32, #tpu.memory_space<vmem>>, %arg5: memref<1x96xf32, #tpu.memory_space<vmem>>, %arg6: memref<32x32xf32, #tpu.memory_space<vmem>>, %arg7: memref<1x32xf32, #tpu.memory_space<vmem>>, %arg8: memref<1x32xf32, #tpu.memory_space<vmem>>, %arg9: memref<1x32xf32, #tpu.memory_space<vmem>>, %arg10: memref<32x64xf32, #tpu.memory_space<vmem>>, %arg11: memref<1x64xf32, #tpu.memory_space<vmem>>, %arg12: memref<64x32xf32, #tpu.memory_space<vmem>>, %arg13: memref<1x32xf32, #tpu.memory_space<vmem>>, %arg14: memref<2x8x32xf32, #tpu.memory_space<vmem>>) attributes {dimension_semantics = [], scalar_prefetch = 0 : i64, scratch_operands = 0 : i64, tpu.core_type = #tpu.core_type<tc>} {
    %c0 = arith.constant 0 : index
    %c0_0 = arith.constant 0 : index
    %c0_1 = arith.constant 0 : index
    %0 = vector.load %arg0[%c0, %c0_0, %c0_1] : memref<2x8x32xf32, #tpu.memory_space<vmem>>, vector<2x8x32xf32>
    %1 = vector.shape_cast %0 : vector<2x8x32xf32> to vector<16x32xf32>
    %c0_2 = arith.constant 0 : index
    %c0_3 = arith.constant 0 : index
    %c0_4 = arith.constant 0 : index
    %2 = vector.load %arg1[%c0_2, %c0_3, %c0_4] : memref<2x8x8xf32, #tpu.memory_space<vmem>>, vector<2x8x8xf32>
    %c0_5 = arith.constant 0 : index
    %c0_6 = arith.constant 0 : index
    %3 = vector.load %arg2[%c0_5, %c0_6] : memref<1x32xf32, #tpu.memory_space<vmem>>, vector<1x32xf32>
    %c0_7 = arith.constant 0 : index
    %c0_8 = arith.constant 0 : index
    %4 = vector.load %arg3[%c0_7, %c0_8] : memref<1x32xf32, #tpu.memory_space<vmem>>, vector<1x32xf32>
    %cst = arith.constant dense<0.000000e+00> : vector<16xf32>
    %5 = vector.multi_reduction <add>, %1, %cst [1] : vector<16x32xf32> to vector<16xf32>
    %6 = vector.shape_cast %5 : vector<16xf32> to vector<16x1xf32>
    %cst_9 = arith.constant 3.200000e+01 : f32
    %7 = vector.broadcast %cst_9 : f32 to vector<16x1xf32>
    %8 = arith.divf %6, %7 : vector<16x1xf32>
    %9 = vector.broadcast %8 : vector<16x1xf32> to vector<16x32xf32>
    %10 = arith.subf %1, %9 : vector<16x32xf32>
    %11 = arith.mulf %10, %10 : vector<16x32xf32>
    %cst_10 = arith.constant dense<0.000000e+00> : vector<16xf32>
    %12 = vector.multi_reduction <add>, %11, %cst_10 [1] : vector<16x32xf32> to vector<16xf32>
    %13 = vector.shape_cast %12 : vector<16xf32> to vector<16x1xf32>
    %cst_11 = arith.constant 0.0322580636 : f32
    %14 = vector.broadcast %cst_11 : f32 to vector<16x1xf32>
    %15 = arith.mulf %13, %14 : vector<16x1xf32>
    %16 = math.sqrt %15 : vector<16x1xf32>
    %cst_12 = arith.constant 9.99999997E-7 : f32
    %17 = vector.broadcast %cst_12 : f32 to vector<16x1xf32>
    %18 = arith.addf %16, %17 : vector<16x1xf32>
    %19 = tpu.reciprocal %18 : vector<16x1xf32> -> vector<16x1xf32>
    %20 = vector.broadcast %8 : vector<16x1xf32> to vector<16x32xf32>
    %21 = arith.subf %1, %20 : vector<16x32xf32>
    %22 = vector.broadcast %3 : vector<1x32xf32> to vector<16x32xf32>
    %23 = arith.mulf %22, %21 : vector<16x32xf32>
    %24 = vector.broadcast %19 : vector<16x1xf32> to vector<16x32xf32>
    %25 = arith.mulf %23, %24 : vector<16x32xf32>
    %26 = vector.broadcast %4 : vector<1x32xf32> to vector<16x32xf32>
    %27 = arith.addf %25, %26 : vector<16x32xf32>
    %c0_13 = arith.constant 0 : index
    %c0_14 = arith.constant 0 : index
    %28 = vector.load %arg4[%c0_13, %c0_14] : memref<32x96xf32, #tpu.memory_space<vmem>>, vector<32x96xf32>
    %cst_15 = arith.constant dense<0.000000e+00> : vector<16x96xf32>
    %29 = tpu.matmul %27, %28, %cst_15 {dimension_numbers = #tpu.dot_dimension_numbers<[1], [0], [0], [1], [0, 0, 1, 1], [], []>} : vector<16x32xf32>, vector<32x96xf32>, vector<16x96xf32> -> vector<16x96xf32>
    %c0_16 = arith.constant 0 : index
    %c0_17 = arith.constant 0 : index
    %30 = vector.load %arg5[%c0_16, %c0_17] : memref<1x96xf32, #tpu.memory_space<vmem>>, vector<1x96xf32>
    %31 = vector.broadcast %30 : vector<1x96xf32> to vector<16x96xf32>
    %32 = arith.addf %29, %31 : vector<16x96xf32>
    %33 = vector.extract_strided_slice %32 {offsets = [0, 0], sizes = [16, 32], strides = [1, 1]} : vector<16x96xf32> to vector<16x32xf32>
    %34 = vector.shape_cast %33 : vector<16x32xf32> to vector<2x8x32xf32>
    %35 = vector.extract_strided_slice %32 {offsets = [0, 32], sizes = [16, 32], strides = [1, 1]} : vector<16x96xf32> to vector<16x32xf32>
    %36 = vector.shape_cast %35 : vector<16x32xf32> to vector<2x8x32xf32>
    %37 = vector.extract_strided_slice %32 {offsets = [0, 64], sizes = [16, 32], strides = [1, 1]} : vector<16x96xf32> to vector<16x32xf32>
    %38 = vector.shape_cast %37 : vector<16x32xf32> to vector<2x8x32xf32>
    %39 = vector.extract_strided_slice %34 {offsets = [0, 0, 0], sizes = [2, 8, 8], strides = [1, 1, 1]} : vector<2x8x32xf32> to vector<2x8x8xf32>
    %40 = vector.extract_strided_slice %36 {offsets = [0, 0, 0], sizes = [2, 8, 8], strides = [1, 1, 1]} : vector<2x8x32xf32> to vector<2x8x8xf32>
    %41 = vector.extract_strided_slice %38 {offsets = [0, 0, 0], sizes = [2, 8, 8], strides = [1, 1, 1]} : vector<2x8x32xf32> to vector<2x8x8xf32>
    "tpu.trace_start"() <{level = 10 : i32, message = "bqd,bkd->bqk"}> : () -> ()
    %cst_18 = arith.constant dense<0.000000e+00> : vector<2x8x8xf32>
    %42 = tpu.matmul %39, %40, %cst_18 {dimension_numbers = #tpu.dot_dimension_numbers<[2], [2], [1], [1], [0, 0, 0, 1, 1, 1], [0], [0]>} : vector<2x8x8xf32>, vector<2x8x8xf32>, vector<2x8x8xf32> -> vector<2x8x8xf32>
    "tpu.trace_stop"() : () -> ()
    %43 = arith.addf %42, %2 : vector<2x8x8xf32>
    %cst_19 = arith.constant dense<0xFF800000> : vector<2x8xf32>
    %44 = vector.multi_reduction <maximumf>, %43, %cst_19 [2] : vector<2x8x8xf32> to vector<2x8xf32>
    %45 = vector.shape_cast %44 : vector<2x8xf32> to vector<2x8x1xf32>
    %46 = vector.broadcast %45 : vector<2x8x1xf32> to vector<2x8x8xf32>
    %47 = arith.subf %43, %46 : vector<2x8x8xf32>
    %48 = math.exp %47 : vector<2x8x8xf32>
    %cst_20 = arith.constant dense<0.000000e+00> : vector<2x8xf32>
    %49 = vector.multi_reduction <add>, %48, %cst_20 [2] : vector<2x8x8xf32> to vector<2x8xf32>
    %50 = vector.shape_cast %49 : vector<2x8xf32> to vector<2x8x1xf32>
    %51 = tpu.reciprocal %50 {approx = true} : vector<2x8x1xf32> -> vector<2x8x1xf32>
    %52 = vector.broadcast %51 : vector<2x8x1xf32> to vector<2x8x8xf32>
    %53 = arith.mulf %48, %52 : vector<2x8x8xf32>
    "tpu.trace_start"() <{level = 10 : i32, message = "bqk,bkd->bqd"}> : () -> ()
    %cst_21 = arith.constant dense<0.000000e+00> : vector<2x8x8xf32>
    %54 = tpu.matmul %53, %41, %cst_21 {dimension_numbers = #tpu.dot_dimension_numbers<[2], [1], [1], [2], [0, 0, 0, 1, 1, 2], [0], [0]>} : vector<2x8x8xf32>, vector<2x8x8xf32>, vector<2x8x8xf32> -> vector<2x8x8xf32>
    "tpu.trace_stop"() : () -> ()
    %55 = vector.extract_strided_slice %34 {offsets = [0, 0, 8], sizes = [2, 8, 8], strides = [1, 1, 1]} : vector<2x8x32xf32> to vector<2x8x8xf32>
    %56 = vector.extract_strided_slice %36 {offsets = [0, 0, 8], sizes = [2, 8, 8], strides = [1, 1, 1]} : vector<2x8x32xf32> to vector<2x8x8xf32>
    %57 = vector.extract_strided_slice %38 {offsets = [0, 0, 8], sizes = [2, 8, 8], strides = [1, 1, 1]} : vector<2x8x32xf32> to vector<2x8x8xf32>
    "tpu.trace_start"() <{level = 10 : i32, message = "bqd,bkd->bqk"}> : () -> ()
    %cst_22 = arith.constant dense<0.000000e+00> : vector<2x8x8xf32>
    %58 = tpu.matmul %55, %56, %cst_22 {dimension_numbers = #tpu.dot_dimension_numbers<[2], [2], [1], [1], [0, 0, 0, 1, 1, 1], [0], [0]>} : vector<2x8x8xf32>, vector<2x8x8xf32>, vector<2x8x8xf32> -> vector<2x8x8xf32>
    "tpu.trace_stop"() : () -> ()
    %59 = arith.addf %58, %2 : vector<2x8x8xf32>
    %cst_23 = arith.constant dense<0xFF800000> : vector<2x8xf32>
    %60 = vector.multi_reduction <maximumf>, %59, %cst_23 [2] : vector<2x8x8xf32> to vector<2x8xf32>
    %61 = vector.shape_cast %60 : vector<2x8xf32> to vector<2x8x1xf32>
    %62 = vector.broadcast %61 : vector<2x8x1xf32> to vector<2x8x8xf32>
    %63 = arith.subf %59, %62 : vector<2x8x8xf32>
    %64 = math.exp %63 : vector<2x8x8xf32>
    %cst_24 = arith.constant dense<0.000000e+00> : vector<2x8xf32>
    %65 = vector.multi_reduction <add>, %64, %cst_24 [2] : vector<2x8x8xf32> to vector<2x8xf32>
    %66 = vector.shape_cast %65 : vector<2x8xf32> to vector<2x8x1xf32>
    %67 = tpu.reciprocal %66 {approx = true} : vector<2x8x1xf32> -> vector<2x8x1xf32>
    %68 = vector.broadcast %67 : vector<2x8x1xf32> to vector<2x8x8xf32>
    %69 = arith.mulf %64, %68 : vector<2x8x8xf32>
    "tpu.trace_start"() <{level = 10 : i32, message = "bqk,bkd->bqd"}> : () -> ()
    %cst_25 = arith.constant dense<0.000000e+00> : vector<2x8x8xf32>
    %70 = tpu.matmul %69, %57, %cst_25 {dimension_numbers = #tpu.dot_dimension_numbers<[2], [1], [1], [2], [0, 0, 0, 1, 1, 2], [0], [0]>} : vector<2x8x8xf32>, vector<2x8x8xf32>, vector<2x8x8xf32> -> vector<2x8x8xf32>
    "tpu.trace_stop"() : () -> ()
    %71 = vector.extract_strided_slice %34 {offsets = [0, 0, 16], sizes = [2, 8, 8], strides = [1, 1, 1]} : vector<2x8x32xf32> to vector<2x8x8xf32>
    %72 = vector.extract_strided_slice %36 {offsets = [0, 0, 16], sizes = [2, 8, 8], strides = [1, 1, 1]} : vector<2x8x32xf32> to vector<2x8x8xf32>
    %73 = vector.extract_strided_slice %38 {offsets = [0, 0, 16], sizes = [2, 8, 8], strides = [1, 1, 1]} : vector<2x8x32xf32> to vector<2x8x8xf32>
    "tpu.trace_start"() <{level = 10 : i32, message = "bqd,bkd->bqk"}> : () -> ()
    %cst_26 = arith.constant dense<0.000000e+00> : vector<2x8x8xf32>
    %74 = tpu.matmul %71, %72, %cst_26 {dimension_numbers = #tpu.dot_dimension_numbers<[2], [2], [1], [1], [0, 0, 0, 1, 1, 1], [0], [0]>} : vector<2x8x8xf32>, vector<2x8x8xf32>, vector<2x8x8xf32> -> vector<2x8x8xf32>
    "tpu.trace_stop"() : () -> ()
    %75 = arith.addf %74, %2 : vector<2x8x8xf32>
    %cst_27 = arith.constant dense<0xFF800000> : vector<2x8xf32>
    %76 = vector.multi_reduction <maximumf>, %75, %cst_27 [2] : vector<2x8x8xf32> to vector<2x8xf32>
    %77 = vector.shape_cast %76 : vector<2x8xf32> to vector<2x8x1xf32>
    %78 = vector.broadcast %77 : vector<2x8x1xf32> to vector<2x8x8xf32>
    %79 = arith.subf %75, %78 : vector<2x8x8xf32>
    %80 = math.exp %79 : vector<2x8x8xf32>
    %cst_28 = arith.constant dense<0.000000e+00> : vector<2x8xf32>
    %81 = vector.multi_reduction <add>, %80, %cst_28 [2] : vector<2x8x8xf32> to vector<2x8xf32>
    %82 = vector.shape_cast %81 : vector<2x8xf32> to vector<2x8x1xf32>
    %83 = tpu.reciprocal %82 {approx = true} : vector<2x8x1xf32> -> vector<2x8x1xf32>
    %84 = vector.broadcast %83 : vector<2x8x1xf32> to vector<2x8x8xf32>
    %85 = arith.mulf %80, %84 : vector<2x8x8xf32>
    "tpu.trace_start"() <{level = 10 : i32, message = "bqk,bkd->bqd"}> : () -> ()
    %cst_29 = arith.constant dense<0.000000e+00> : vector<2x8x8xf32>
    %86 = tpu.matmul %85, %73, %cst_29 {dimension_numbers = #tpu.dot_dimension_numbers<[2], [1], [1], [2], [0, 0, 0, 1, 1, 2], [0], [0]>} : vector<2x8x8xf32>, vector<2x8x8xf32>, vector<2x8x8xf32> -> vector<2x8x8xf32>
    "tpu.trace_stop"() : () -> ()
    %87 = vector.extract_strided_slice %34 {offsets = [0, 0, 24], sizes = [2, 8, 8], strides = [1, 1, 1]} : vector<2x8x32xf32> to vector<2x8x8xf32>
    %88 = vector.extract_strided_slice %36 {offsets = [0, 0, 24], sizes = [2, 8, 8], strides = [1, 1, 1]} : vector<2x8x32xf32> to vector<2x8x8xf32>
    %89 = vector.extract_strided_slice %38 {offsets = [0, 0, 24], sizes = [2, 8, 8], strides = [1, 1, 1]} : vector<2x8x32xf32> to vector<2x8x8xf32>
    "tpu.trace_start"() <{level = 10 : i32, message = "bqd,bkd->bqk"}> : () -> ()
    %cst_30 = arith.constant dense<0.000000e+00> : vector<2x8x8xf32>
    %90 = tpu.matmul %87, %88, %cst_30 {dimension_numbers = #tpu.dot_dimension_numbers<[2], [2], [1], [1], [0, 0, 0, 1, 1, 1], [0], [0]>} : vector<2x8x8xf32>, vector<2x8x8xf32>, vector<2x8x8xf32> -> vector<2x8x8xf32>
    "tpu.trace_stop"() : () -> ()
    %91 = arith.addf %90, %2 : vector<2x8x8xf32>
    %cst_31 = arith.constant dense<0xFF800000> : vector<2x8xf32>
    %92 = vector.multi_reduction <maximumf>, %91, %cst_31 [2] : vector<2x8x8xf32> to vector<2x8xf32>
    %93 = vector.shape_cast %92 : vector<2x8xf32> to vector<2x8x1xf32>
    %94 = vector.broadcast %93 : vector<2x8x1xf32> to vector<2x8x8xf32>
    %95 = arith.subf %91, %94 : vector<2x8x8xf32>
    %96 = math.exp %95 : vector<2x8x8xf32>
    %cst_32 = arith.constant dense<0.000000e+00> : vector<2x8xf32>
    %97 = vector.multi_reduction <add>, %96, %cst_32 [2] : vector<2x8x8xf32> to vector<2x8xf32>
    %98 = vector.shape_cast %97 : vector<2x8xf32> to vector<2x8x1xf32>
    %99 = tpu.reciprocal %98 {approx = true} : vector<2x8x1xf32> -> vector<2x8x1xf32>
    %100 = vector.broadcast %99 : vector<2x8x1xf32> to vector<2x8x8xf32>
    %101 = arith.mulf %96, %100 : vector<2x8x8xf32>
    "tpu.trace_start"() <{level = 10 : i32, message = "bqk,bkd->bqd"}> : () -> ()
    %cst_33 = arith.constant dense<0.000000e+00> : vector<2x8x8xf32>
    %102 = tpu.matmul %101, %89, %cst_33 {dimension_numbers = #tpu.dot_dimension_numbers<[2], [1], [1], [2], [0, 0, 0, 1, 1, 2], [0], [0]>} : vector<2x8x8xf32>, vector<2x8x8xf32>, vector<2x8x8xf32> -> vector<2x8x8xf32>
    "tpu.trace_stop"() : () -> ()
    %103 = tpu.concatenate %54, %70, %86, %102 in 2 : vector<2x8x8xf32>, vector<2x8x8xf32>, vector<2x8x8xf32>, vector<2x8x8xf32> -> vector<2x8x32xf32>
    %104 = vector.shape_cast %103 : vector<2x8x32xf32> to vector<16x32xf32>
    %c0_34 = arith.constant 0 : index
    %c0_35 = arith.constant 0 : index
    %105 = vector.load %arg6[%c0_34, %c0_35] : memref<32x32xf32, #tpu.memory_space<vmem>>, vector<32x32xf32>
    %cst_36 = arith.constant dense<0.000000e+00> : vector<16x32xf32>
    %106 = tpu.matmul %104, %105, %cst_36 {dimension_numbers = #tpu.dot_dimension_numbers<[1], [0], [0], [1], [0, 0, 1, 1], [], []>} : vector<16x32xf32>, vector<32x32xf32>, vector<16x32xf32> -> vector<16x32xf32>
    %c0_37 = arith.constant 0 : index
    %c0_38 = arith.constant 0 : index
    %107 = vector.load %arg7[%c0_37, %c0_38] : memref<1x32xf32, #tpu.memory_space<vmem>>, vector<1x32xf32>
    %108 = vector.broadcast %107 : vector<1x32xf32> to vector<16x32xf32>
    %109 = arith.addf %106, %108 : vector<16x32xf32>
    %110 = arith.addf %1, %109 : vector<16x32xf32>
    %c0_39 = arith.constant 0 : index
    %c0_40 = arith.constant 0 : index
    %111 = vector.load %arg8[%c0_39, %c0_40] : memref<1x32xf32, #tpu.memory_space<vmem>>, vector<1x32xf32>
    %c0_41 = arith.constant 0 : index
    %c0_42 = arith.constant 0 : index
    %112 = vector.load %arg9[%c0_41, %c0_42] : memref<1x32xf32, #tpu.memory_space<vmem>>, vector<1x32xf32>
    %cst_43 = arith.constant dense<0.000000e+00> : vector<16xf32>
    %113 = vector.multi_reduction <add>, %110, %cst_43 [1] : vector<16x32xf32> to vector<16xf32>
    %114 = vector.shape_cast %113 : vector<16xf32> to vector<16x1xf32>
    %cst_44 = arith.constant 3.200000e+01 : f32
    %115 = vector.broadcast %cst_44 : f32 to vector<16x1xf32>
    %116 = arith.divf %114, %115 : vector<16x1xf32>
    %117 = vector.broadcast %116 : vector<16x1xf32> to vector<16x32xf32>
    %118 = arith.subf %110, %117 : vector<16x32xf32>
    %119 = arith.mulf %118, %118 : vector<16x32xf32>
    %cst_45 = arith.constant dense<0.000000e+00> : vector<16xf32>
    %120 = vector.multi_reduction <add>, %119, %cst_45 [1] : vector<16x32xf32> to vector<16xf32>
    %121 = vector.shape_cast %120 : vector<16xf32> to vector<16x1xf32>
    %cst_46 = arith.constant 0.0322580636 : f32
    %122 = vector.broadcast %cst_46 : f32 to vector<16x1xf32>
    %123 = arith.mulf %121, %122 : vector<16x1xf32>
    %124 = math.sqrt %123 : vector<16x1xf32>
    %cst_47 = arith.constant 9.99999997E-7 : f32
    %125 = vector.broadcast %cst_47 : f32 to vector<16x1xf32>
    %126 = arith.addf %124, %125 : vector<16x1xf32>
    %127 = tpu.reciprocal %126 : vector<16x1xf32> -> vector<16x1xf32>
    %128 = vector.broadcast %116 : vector<16x1xf32> to vector<16x32xf32>
    %129 = arith.subf %110, %128 : vector<16x32xf32>
    %130 = vector.broadcast %111 : vector<1x32xf32> to vector<16x32xf32>
    %131 = arith.mulf %130, %129 : vector<16x32xf32>
    %132 = vector.broadcast %127 : vector<16x1xf32> to vector<16x32xf32>
    %133 = arith.mulf %131, %132 : vector<16x32xf32>
    %134 = vector.broadcast %112 : vector<1x32xf32> to vector<16x32xf32>
    %135 = arith.addf %133, %134 : vector<16x32xf32>
    %c0_48 = arith.constant 0 : index
    %c0_49 = arith.constant 0 : index
    %136 = vector.load %arg10[%c0_48, %c0_49] : memref<32x64xf32, #tpu.memory_space<vmem>>, vector<32x64xf32>
    %cst_50 = arith.constant dense<0.000000e+00> : vector<16x64xf32>
    %137 = tpu.matmul %135, %136, %cst_50 {dimension_numbers = #tpu.dot_dimension_numbers<[1], [0], [0], [1], [0, 0, 1, 1], [], []>} : vector<16x32xf32>, vector<32x64xf32>, vector<16x64xf32> -> vector<16x64xf32>
    %c0_51 = arith.constant 0 : index
    %c0_52 = arith.constant 0 : index
    %138 = vector.load %arg11[%c0_51, %c0_52] : memref<1x64xf32, #tpu.memory_space<vmem>>, vector<1x64xf32>
    %139 = vector.broadcast %138 : vector<1x64xf32> to vector<16x64xf32>
    %140 = arith.addf %137, %139 : vector<16x64xf32>
    %cst_53 = arith.constant 0.000000e+00 : f32
    %141 = vector.broadcast %cst_53 : f32 to vector<16x64xf32>
    %142 = arith.maximumf %140, %141 : vector<16x64xf32>
    %c0_54 = arith.constant 0 : index
    %c0_55 = arith.constant 0 : index
    %143 = vector.load %arg12[%c0_54, %c0_55] : memref<64x32xf32, #tpu.memory_space<vmem>>, vector<64x32xf32>
    %cst_56 = arith.constant dense<0.000000e+00> : vector<16x32xf32>
    %144 = tpu.matmul %142, %143, %cst_56 {dimension_numbers = #tpu.dot_dimension_numbers<[1], [0], [0], [1], [0, 0, 1, 1], [], []>} : vector<16x64xf32>, vector<64x32xf32>, vector<16x32xf32> -> vector<16x32xf32>
    %c0_57 = arith.constant 0 : index
    %c0_58 = arith.constant 0 : index
    %145 = vector.load %arg13[%c0_57, %c0_58] : memref<1x32xf32, #tpu.memory_space<vmem>>, vector<1x32xf32>
    %146 = vector.broadcast %145 : vector<1x32xf32> to vector<16x32xf32>
    %147 = arith.addf %144, %146 : vector<16x32xf32>
    %148 = arith.addf %110, %147 : vector<16x32xf32>
    %149 = vector.shape_cast %148 : vector<16x32xf32> to vector<2x8x32xf32>
    %c0_59 = arith.constant 0 : index
    %c0_60 = arith.constant 0 : index
    %c0_61 = arith.constant 0 : index
    %150 = vector.load %arg14[%c0_59, %c0_60, %c0_61] : memref<2x8x32xf32, #tpu.memory_space<vmem>>, vector<2x8x32xf32>
    tpu.vector_store %arg14[%c0_59, %c0_60, %c0_61], %149 {strides = array<i32>} : memref<2x8x32xf32, #tpu.memory_space<vmem>>, vector<2x8x32xf32>,
    return
  }
}

</mosaic_0001>

<bundles_post_ra>
// kernel: encoder_layer.1
= control target key start
LH: loop header
LB: loop body
LE: loop exit
PB: predicated region body
PF: predicated region fallthrough
CT: control target
= control target key end

     0   :  { %vm54_vm0 = vcmask 261120   ;;  %s2662_s0 = inlined_call_operand.vmem [shape: f32[2,8,32], index: 0, kind: input, shape index: {}]   ;;  %s2663_s1 = inlined_call_operand.vmem [shape: f32[2,8,8], index: 1, kind: input, shape index: {}]   ;;  %s2664_s2 = inlined_call_operand.vmem [shape: f32[1,32], index: 2, kind: input, shape index: {}]   ;;  %s2665_s3 = inlined_call_operand.vmem [shape: f32[1,32], index: 3, kind: input, shape index: {}]   ;;  %s2666_s4 = inlined_call_operand.vmem [shape: f32[32,96], index: 4, kind: input, shape index: {}]   ;;  %s2667_s5 = inlined_call_operand.vmem [shape: f32[1,96], index: 5, kind: input, shape index: {}]   ;;  %s2668_s6 = inlined_call_operand.vmem [shape: f32[32,32], index: 6, kind: input, shape index: {}]   ;;  %s2669_s7 = inlined_call_operand.vmem [shape: f32[1,32], index: 7, kind: input, shape index: {}]   ;;  %s2670_s8 = inlined_call_operand.vmem [shape: f32[1,32], index: 8, kind: input, shape index: {}]   ;;  %s2671_s9 = inlined_call_operand.vmem [shape: f32[1,32], index: 9, kind: input, shape index: {}]   ;;  %s2672_s10 = inlined_call_operand.vmem [shape: f32[32,64], index: 10, kind: input, shape index: {}]   ;;  %s2673_s11 = inlined_call_operand.vmem [shape: f32[1,64], index: 11, kind: input, shape index: {}]   ;;  %s2674_s12 = inlined_call_operand.vmem [shape: f32[64,32], index: 12, kind: input, shape index: {}]   ;;  %s2675_s13 = inlined_call_operand.vmem [shape: f32[1,32], index: 13, kind: input, shape index: {}]   ;;  %s2676_s14 = inlined_call_operand.hbm [shape: f32[2,8,32], index: 14, kind: output, shape index: {}]  }
   0x1   :  { %v2376_v0 = vld [vmem:[%s2662_s0] sm:$0xff]  ;;  %v2381_v1 = vld [vmem:[%s2662_s0 + $0x8] sm:$0xff] }
   0x2   :  { %v55_v2 = vsel %vm54_vm0, %v2376_v0, 0.0 }
   0x3   :  { %19 = vsyncpa [#allocation3], 0  ;;  %56 = vadd.xlane.f32.xlu0 %v55_v2  ;;  %v58_v3 = vsel %vm54_vm0, %v2381_v1, 0.0  ;;  %v112_v14 = vld [vmem:[%s2666_s4] sm:$0xff]  ;;  %v113_v15 = vld [vmem:[%s2666_s4 + $0x8] sm:$0xff]  ;;  %v2280_v46 = vmov 0.0  }
   0x4   :  { %v114_v16 = vld [vmem:[%s2666_s4 + $0x10] sm:$0xff]  ;;  %v2150_v17 = vpack.c.bf16 %v113_v15, %v112_v14  ;;  %v115_v18 = vld [vmem:[%s2666_s4 + $0x18] sm:$0xff]  ;;  %v1918_v36 = vld [vmem:[%s2664_s2] ss:$0 sm:$0xff]  ;;  %2039 = vmatprep.subr.mxu0 %v2280_v46  ;;  %vm2281_vm5 = vmmov 0   ;;  %s2282_s27 = smov 96  }
   0x5   :  { %v2154_v19 = vpack.c.bf16 %v115_v18, %v114_v16  ;;  %v1919_v39 = vld [vmem:[%s2665_s3] ss:$0 sm:$0xff]  ;;  %2041 = vmatprep.mubr.msk.f32.mxu0 %vm2281_vm5, %v2280_v46  ;;  %vm207_vm6 = vcmask 64512   ;;  %v2447_v58 = vld [vmem:[%s2663_s1 + $0x8] sm:$0xff]  ;;  %s2283_s15 = smov 64   ;;  %s2284_s16 = smov 88  }
   0x6   :  { %2151 = vmatprep.subr.bf16.mxu1 %v2150_v17  ;;  %v1920_v47 = vld [vmem:[%s2667_s5] ss:$0 sm:$0xff]  ;;  %s2286_s0 = smov 56   ;;  %s2287_s17 = smov 80   ;;  %vm1552_vm7 = vcmask 195584   ;;  %vm1549_vm8 = vcmask 130048  }
   0x7   :  { %59 = vadd.xlane.f32.xlu0 %v58_v3  ;;  %2153 = vmatpush3.bf16.msra.mxu1 %v2150_v17  ;;  %v2441_v54 = vld [vmem:[%s2663_s1] sm:$0xff]  ;;  %s2285_s1 = smov 120   ;;  %s2288_s18 = smov 112   ;;  %vm1816_vm13 = vcmask 523264  }
   0x8   :  { %2155 = vmatprep.subr.bf16.mxu1 %v2154_v19  ;;  %s2289_s19 = smov 48   ;;  %s2290_s20 = smov 72  }
   0x9   :  { %s2291_s21 = smov 104   ;;  %s2292_s22 = smov 40  }
   0xa   :  { %s2293_s23 = smov 8   ;;  %s2294_s4 = smov 16  }
   0xb   :  { %2157 = vmatpush3.bf16.msra.mxu1 %v2154_v19  ;;  %s2295_s29 = smov 24  }
   0xc   :  { %2029 = vmatprep.subr.mxu1 %v2280_v46 }
  0x90   :  { %v57_v4 = vpop.xlane.xlu0 %56 }
  0x91   :  { %v62_v5 = vmul.f32 0.03125, %v57_v4 }
  0x93   :  { %v64_v6 = vsub.f32 %v2376_v0, %v62_v5 }
  0x94   :  { %v60_v7 = vpop.xlane.xlu0 %59 }
  0x95   :  { %v63_v8 = vmul.f32 0.03125, %v60_v7  ;;  %v66_v9 = vmul.f32 %v64_v6, %v64_v6  ;;  %v100_v37 = vmul.f32 %v1918_v36, %v64_v6 }
  0x97   :  { %v65_v10 = vsub.f32 %v2381_v1, %v63_v8  ;;  %v68_v11 = vsel %vm54_vm0, %v66_v9, 0.0 }
  0x98   :  { %69 = vadd.xlane.f32.xlu1 %v68_v11 }
  0x99   :  { %v67_v12 = vmul.f32 %v65_v10, %v65_v10  ;;  %v101_v41 = vmul.f32 %v1918_v36, %v65_v10 }
  0x9b   :  { %v71_v13 = vsel %vm54_vm0, %v67_v12, 0.0 }
  0x9c   :  { %72 = vadd.xlane.f32.xlu1 %v71_v13 }
 0x125   :  { %v70_v20 = vpop.xlane.xlu1 %69 }
 0x126   :  { %v74_v21 = vmul.f32 0.032258064, %v70_v20 }
 0x128   :  { %2208 = vrsqrt.f32 %v74_v21  ;;  %vm78_vm1 = vcmp.eq.f32.partialorder %v74_v21, inf  ;;  %v81_v26 = vand.u32 2147483648, %v74_v21  ;;  %vm80_vm2 = vcmp.eq.f32.partialorder %v74_v21, 0.0 }
 0x129   :  { %v73_v22 = vpop.xlane.xlu1 %72 }
 0x12a   :  { %v75_v23 = vmul.f32 0.032258064, %v73_v22 }
 0x12c   :  { %2210 = vrsqrt.f32 %v75_v23  ;;  %vm85_vm3 = vcmp.eq.f32.partialorder %v75_v23, inf  ;;  %v88_v32 = vand.u32 2147483648, %v75_v23  ;;  %vm87_vm4 = vcmp.eq.f32.partialorder %v75_v23, 0.0 }
 0x132   :  { %v2209_v24 = vpop.eup %2208 }
 0x133   :  { %v77_v25 = vmul.f32 %v2209_v24, %v74_v21 }
 0x135   :  { %v79_v27 = vsel %vm78_vm1, %v74_v21, %v77_v25 }
 0x136   :  { %v2211_v28 = vpop.eup %2210  ;;  %v82_v29 = vsel %vm80_vm2, %v81_v26, %v79_v27 }
 0x137   :  { %v84_v30 = vmul.f32 %v2211_v28, %v75_v23  ;;  %v90_v31 = vadd.f32 1e-06, %v82_v29 }
 0x139   :  { %v86_v33 = vsel %vm85_vm3, %v75_v23, %v84_v30  ;;  %2212 = vrcp.f32 %v90_v31 }
 0x13a   :  { %v89_v34 = vsel %vm87_vm4, %v88_v32, %v86_v33 }
 0x13b   :  { %v91_v35 = vadd.f32 1e-06, %v89_v34 }
 0x13d   :  { %2214 = vrcp.f32 %v91_v35 }
 0x143   :  { %v2213_v38 = vpop.eup %2212 }
 0x144   :  { %v102_v40 = vmul.f32 %v2213_v38, %v100_v37 }
 0x146   :  { %v110_v42 = vadd.f32 %v1919_v39, %v102_v40 }
 0x147   :  { %v2215_v43 = vpop.eup %2214 }
 0x148   :  { %v103_v44 = vmul.f32 %v2215_v43, %v101_v41  ;;  %2026 = vmatprep.mubr.msk.f32.mxu1 %vm54_vm0, %v110_v42 }
 0x14a   :  { %v111_v45 = vadd.f32 %v1919_v39, %v103_v44 }
 0x14c   :  { %2027 = vmatmul.mubr.msk.f32.vlgmr.msra.gmra.mrb[0].mxu1 %vm54_vm0, %v111_v45 }
 0x14d   :  { %2031 = vmatprep.mubr.msk.f32.mxu1 %vm2281_vm5, %v2280_v46 }
 0x21f   :  { %v2028_v48 = vpop.f32.mrb[0].mxu1 }
 0x220   :  { %v2420_v49 = vadd.f32 %v2028_v48, %v1920_v47  ;;  %v195_v50 = vpop.f32.mrb[1].mxu1 }
 0x221   :  { %v2422_v51 = vadd.f32 %v1920_v47, %v195_v50 }
 0x222   :  { %283 = vrot.lane.b32.xlu1 %v2420_v49, %s2282_s27 }
 0x223   :  { %205 = vrot.lane.b32.xlu0 %v2422_v51, %s2282_s27 }
 0x294   :  { %v284_v53 = vpop.permute.xlu1 %283 }
 0x295   :  { %v206_v52 = vpop.permute.xlu0 %205 }
 0x296   :  { %2030 = vmatpush3.xpose.msk.msra.mxu1 %vm207_vm6, %v206_v52 }
 0x297   :  { %2034 = vmatprep.subr.mxu1 %v2280_v46 }
 0x299   :  { %2032 = vmatmul.mubr.msk.f32.vlgmr.msra.gmra.mrb[2].mxu1 %vm207_vm6, %v2422_v51 }
 0x29a   :  { %2035 = vmatpush3.xpose.msk.msra.mxu1 %vm207_vm6, %v284_v53  ;;  %2036 = vmatprep.mubr.msk.f32.mxu1 %vm2281_vm5, %v2280_v46 }
 0x29b   :  { %2044 = vmatprep.subr.mxu1 %v2280_v46 }
 0x29d   :  { %2037 = vmatmul.mubr.msk.f32.vlgmr.msra.gmra.mrb[4].mxu1 %vm207_vm6, %v2420_v49 }
 0x29e   :  { %2046 = vmatprep.mubr.msk.f32.mxu1 %vm2281_vm5, %v2280_v46 }
 0x36c   :  { %v278_v55 = vpop.f32.mrb[2].mxu1 }
 0x36d   :  { %v279_v56 = vadd.f32 %v278_v55, %v2441_v54  ;;  %v2033_v57 = vpop.f32.mrb[3].mxu1 }
 0x36f   :  { %v359_v59 = vsel %vm207_vm6, %v279_v56, -inf }
 0x370   :  { %360 = vmax.xlane.f32.xlu1 %v359_v59  ;;  %v355_v60 = vpop.f32.mrb[4].mxu1 }
 0x371   :  { %v356_v61 = vadd.f32 %v355_v60, %v2447_v58  ;;  %v2038_v62 = vpop.f32.mrb[5].mxu1 }
 0x373   :  { %v362_v63 = vsel %vm207_vm6, %v356_v61, -inf }
 0x374   :  { %363 = vmax.xlane.f32.xlu0 %v362_v63 }
 0x381   :  { %457 = vrot.lane.b32.xlu1 %v2420_v49, %s2283_s15 }
 0x385   :  { %535 = vrot.lane.b32.xlu1 %v2422_v51, %s2284_s16 }
 0x389   :  { %613 = vrot.lane.b32.xlu1 %v2420_v49, %s2284_s16 }
 0x38a   :  { %381 = vrot.lane.b32.xlu0 %v2422_v51, %s2283_s15 }
 0x3fd   :  { %v361_v2 = vpop.xlane.xlu1 %360 }
 0x3fe   :  { %v365_v3 = vsub.f32 %v279_v56, %v361_v2 }
 0x400   :  { %v367_v4 = vmul.f32 1.442695, %v365_v3 }
 0x401   :  { %v458_v5 = vpop.permute.xlu1 %457  ;;  %v364_v6 = vpop.xlane.xlu0 %363 }
 0x402   :  { %2216 = vpow2.f32 %v367_v4  ;;  %v366_v7 = vsub.f32 %v356_v61, %v364_v6  ;;  %2045 = vmatpush3.msra.mxu1 %v458_v5 }
 0x403   :  { %2054 = vmatprep.subr.mxu1 %v2280_v46 }
 0x404   :  { %v369_v8 = vmul.f32 1.442695, %v366_v7 }
 0x405   :  { %v382_v9 = vpop.permute.xlu0 %381  ;;  %v536_v14 = vpop.permute.xlu1 %535 }
 0x406   :  { %2218 = vpow2.f32 %v369_v8  ;;  %2040 = vmatpush3.msra.mxu0 %v382_v9 }
 0x407   :  { %2049 = vmatprep.subr.mxu0 %v2280_v46 }
 0x409   :  { %v614_v15 = vpop.permute.xlu1 %613 }
 0x40c   :  { %v2217_v10 = vpop.eup %2216 }
 0x40d   :  { %v371_v11 = vsel %vm207_vm6, %v2217_v10, 0.0 }
 0x40e   :  { %372 = vadd.xlane.f32.xlu0 %v371_v11 }
 0x410   :  { %v2219_v12 = vpop.eup %2218 }
 0x411   :  { %v374_v13 = vsel %vm207_vm6, %v2219_v12, 0.0 }
 0x412   :  { %375 = vadd.xlane.f32.xlu1 %v374_v13 }
 0x423   :  { %611 = vrot.lane.b32.xlu1 %v2420_v49, %s2285_s1 }
 0x424   :  { %533 = vrot.lane.b32.xlu0 %v2422_v51, %s2285_s1 }
 0x49b   :  { %v373_v16 = vpop.xlane.xlu0 %372 }
 0x49c   :  { %2220 = vrcp.f32 %v373_v16 }
 0x49f   :  { %v376_v17 = vpop.xlane.xlu1 %375  ;;  %v534_v22 = vpop.permute.xlu0 %533 }
 0x4a0   :  { %2222 = vrcp.f32 %v376_v17 }
 0x4a3   :  { %v612_v23 = vpop.permute.xlu1 %611 }
 0x4a6   :  { %v2221_v18 = vpop.eup %2220 }
 0x4a7   :  { %v379_v19 = vmul.f32 %v2221_v18, %v2217_v10 }
 0x4a9   :  { %2042 = vmatmul.mubr.msk.f32.vlgmr.msra.gmra.mrb[0].mxu0 %vm207_vm6, %v379_v19 }
 0x4aa   :  { %v2223_v20 = vpop.eup %2222  ;;  %2050 = vmatpush3.xpose.msk.msra.mxu0 %vm207_vm6, %v536_v14  ;;  %2051 = vmatprep.mubr.msk.f32.mxu0 %vm2281_vm5, %v2280_v46 }
 0x4ab   :  { %v380_v21 = vmul.f32 %v2223_v20, %v2219_v12  ;;  %2059 = vmatprep.subr.mxu0 %v2280_v46 }
 0x4ad   :  { %2047 = vmatmul.mubr.msk.f32.vlgmr.msra.gmra.mrb[6].mxu1 %vm207_vm6, %v380_v21  ;;  %2052 = vmatmul.mubr.msk.f32.vlgmr.msra.gmra.mrb[2].mxu0 %vm207_vm6, %v534_v22 }
 0x4ae   :  { %2055 = vmatpush3.xpose.msk.msra.mxu1 %vm207_vm6, %v614_v15  ;;  %2056 = vmatprep.mubr.msk.f32.mxu1 %vm2281_vm5, %v2280_v46 }
 0x4af   :  { %2064 = vmatprep.subr.mxu1 %v2280_v46  ;;  %2061 = vmatprep.mubr.msk.f32.mxu0 %vm2281_vm5, %v2280_v46 }
 0x4b1   :  { %2057 = vmatmul.mubr.msk.f32.vlgmr.msra.gmra.mrb[8].mxu1 %vm207_vm6, %v612_v23 }
 0x4b2   :  { %2066 = vmatprep.mubr.msk.f32.mxu1 %vm2281_vm5, %v2280_v46 }
 0x57c   :  { %v2478_v24 = vpop.f32.mrb[0].mxu0 }
 0x57d   :  { %v2043_v25 = vpop.f32.mrb[1].mxu0 }
 0x580   :  { %v2480_v26 = vpop.f32.mrb[6].mxu1  ;;  %v607_v27 = vpop.f32.mrb[2].mxu0 }
 0x581   :  { %v608_v28 = vadd.f32 %v607_v27, %v2441_v54  ;;  %v2048_v29 = vpop.f32.mrb[7].mxu1  ;;  %v2053_v30 = vpop.f32.mrb[3].mxu0 }
 0x583   :  { %v689_v31 = vsel %vm207_vm6, %v608_v28, -inf }
 0x584   :  { %690 = vmax.xlane.f32.xlu0 %v689_v31  ;;  %v685_v32 = vpop.f32.mrb[8].mxu1 }
 0x585   :  { %v686_v33 = vadd.f32 %v685_v32, %v2447_v58  ;;  %v2058_v34 = vpop.f32.mrb[9].mxu1 }
 0x587   :  { %v692_v35 = vsel %vm207_vm6, %v686_v33, -inf }
 0x588   :  { %693 = vmax.xlane.f32.xlu1 %v692_v35 }
 0x599   :  { %787 = vrot.lane.b32.xlu1 %v2420_v49, %s2286_s0 }
 0x59a   :  { %711 = vrot.lane.b32.xlu0 %v2422_v51, %s2286_s0 }
 0x59d   :  { %865 = vrot.lane.b32.xlu1 %v2422_v51, %s2287_s17 }
 0x5a1   :  { %943 = vrot.lane.b32.xlu1 %v2420_v49, %s2287_s17 }
 0x5a5   :  { %941 = vrot.lane.b32.xlu1 %v2420_v49, %s2288_s18 }
 0x611   :  { %v691_v36 = vpop.xlane.xlu0 %690 }
 0x612   :  { %v695_v37 = vsub.f32 %v608_v28, %v691_v36 }
 0x614   :  { %v697_v38 = vmul.f32 1.442695, %v695_v37 }
 0x615   :  { %v712_v39 = vpop.permute.xlu0 %711  ;;  %v694_v40 = vpop.xlane.xlu1 %693 }
 0x616   :  { %2224 = vpow2.f32 %v697_v38  ;;  %v696_v41 = vsub.f32 %v686_v33, %v694_v40  ;;  %2060 = vmatpush3.msra.mxu0 %v712_v39 }
 0x617   :  { %2069 = vmatprep.subr.mxu0 %v2280_v46 }
 0x618   :  { %v699_v42 = vmul.f32 1.442695, %v696_v41 }
 0x619   :  { %v788_v43 = vpop.permute.xlu1 %787 }
 0x61a   :  { %2226 = vpow2.f32 %v699_v42  ;;  %2065 = vmatpush3.msra.mxu1 %v788_v43 }
 0x61b   :  { %2074 = vmatprep.subr.mxu1 %v2280_v46 }
 0x61d   :  { %v866_v53 = vpop.permute.xlu1 %865 }
 0x620   :  { %v2225_v44 = vpop.eup %2224 }
 0x621   :  { %v701_v45 = vsel %vm207_vm6, %v2225_v44, 0.0  ;;  %v944_v59 = vpop.permute.xlu1 %943 }
 0x622   :  { %702 = vadd.xlane.f32.xlu0 %v701_v45 }
 0x624   :  { %v2227_v47 = vpop.eup %2226 }
 0x625   :  { %v704_v48 = vsel %vm207_vm6, %v2227_v47, 0.0  ;;  %v942_v62 = vpop.permute.xlu1 %941 }
 0x626   :  { %705 = vadd.xlane.f32.xlu0 %v704_v48 }
 0x63c   :  { %863 = vrot.lane.b32.xlu0 %v2422_v51, %s2288_s18 }
 0x6af   :  { %v703_v50 = vpop.xlane.xlu0 %702 }
 0x6b0   :  { %2228 = vrcp.f32 %v703_v50 }
 0x6b3   :  { %v706_v52 = vpop.xlane.xlu0 %705 }
 0x6b4   :  { %2230 = vrcp.f32 %v706_v52 }
 0x6b7   :  { %v864_v61 = vpop.permute.xlu0 %863 }
 0x6ba   :  { %v2229_v55 = vpop.eup %2228 }
 0x6bb   :  { %v709_v56 = vmul.f32 %v2229_v55, %v2225_v44 }
 0x6bd   :  { %2062 = vmatmul.mubr.msk.f32.vlgmr.msra.gmra.mrb[4].mxu0 %vm207_vm6, %v709_v56 }
 0x6be   :  { %v2231_v57 = vpop.eup %2230  ;;  %2070 = vmatpush3.xpose.msk.msra.mxu0 %vm207_vm6, %v866_v53  ;;  %2071 = vmatprep.mubr.msk.f32.mxu0 %vm2281_vm5, %v2280_v46 }
 0x6bf   :  { %v710_v60 = vmul.f32 %v2231_v57, %v2227_v47  ;;  %2079 = vmatprep.subr.mxu0 %v2280_v46 }
 0x6c1   :  { %2067 = vmatmul.mubr.msk.f32.vlgmr.msra.gmra.mrb[10].mxu1 %vm207_vm6, %v710_v60  ;;  %2072 = vmatmul.mubr.msk.f32.vlgmr.msra.gmra.mrb[6].mxu0 %vm207_vm6, %v864_v61 }
 0x6c2   :  { %2075 = vmatpush3.xpose.msk.msra.mxu1 %vm207_vm6, %v944_v59  ;;  %2076 = vmatprep.mubr.msk.f32.mxu1 %vm2281_vm5, %v2280_v46 }
 0x6c3   :  { %2084 = vmatprep.subr.mxu1 %v2280_v46  ;;  %2081 = vmatprep.mubr.msk.f32.mxu0 %vm2281_vm5, %v2280_v46 }
 0x6c5   :  { %2077 = vmatmul.mubr.msk.f32.vlgmr.msra.gmra.mrb[12].mxu1 %vm207_vm6, %v942_v62 }
 0x6c6   :  { %2086 = vmatprep.mubr.msk.f32.mxu1 %vm2281_vm5, %v2280_v46 }
 0x790   :  { %v2512_v63 = vpop.f32.mrb[4].mxu0 }
 0x791   :  { %v2063_v2 = vpop.f32.mrb[5].mxu0 }
 0x794   :  { %v2514_v3 = vpop.f32.mrb[10].mxu1  ;;  %v937_v4 = vpop.f32.mrb[6].mxu0 }
 0x795   :  { %v938_v5 = vadd.f32 %v937_v4, %v2441_v54  ;;  %v2068_v6 = vpop.f32.mrb[11].mxu1  ;;  %v2073_v7 = vpop.f32.mrb[7].mxu0 }
 0x796   :  { %v1555_v6 = vld [vmem:[%s2668_s6] sm:$0xff] }
 0x797   :  { %v1019_v8 = vsel %vm207_vm6, %v938_v5, -inf }
 0x798   :  { %1020 = vmax.xlane.f32.xlu0 %v1019_v8  ;;  %v1015_v9 = vpop.f32.mrb[12].mxu1  ;;  %v1557_v8 = vld [vmem:[%s2668_s6 + $0x10] sm:$0xff] }
 0x799   :  { %v1016_v10 = vadd.f32 %v1015_v9, %v2447_v58  ;;  %v2078_v11 = vpop.f32.mrb[13].mxu1  ;;  %v1558_v9 = vld [vmem:[%s2668_s6 + $0x18] sm:$0xff] }
 0x79b   :  { %v1022_v12 = vsel %vm207_vm6, %v1016_v10, -inf }
 0x79c   :  { %1023 = vmax.xlane.f32.xlu1 %v1022_v12 }
 0x7ad   :  { %1117 = vrot.lane.b32.xlu1 %v2420_v49, %s2289_s19 }
 0x7ae   :  { %1041 = vrot.lane.b32.xlu0 %v2422_v51, %s2289_s19 }
 0x7b1   :  { %1195 = vrot.lane.b32.xlu1 %v2422_v51, %s2290_s20 }
 0x7b5   :  { %1273 = vrot.lane.b32.xlu1 %v2420_v49, %s2290_s20 }
 0x7b9   :  { %1271 = vrot.lane.b32.xlu1 %v2420_v49, %s2291_s21 }
 0x825   :  { %v1021_v13 = vpop.xlane.xlu0 %1020 }
 0x826   :  { %v1025_v14 = vsub.f32 %v938_v5, %v1021_v13 }
 0x828   :  { %v1027_v15 = vmul.f32 1.442695, %v1025_v14 }
 0x829   :  { %v1042_v16 = vpop.permute.xlu0 %1041  ;;  %v1024_v17 = vpop.xlane.xlu1 %1023 }
 0x82a   :  { %2232 = vpow2.f32 %v1027_v15  ;;  %v1026_v18 = vsub.f32 %v1016_v10, %v1024_v17  ;;  %2080 = vmatpush3.msra.mxu0 %v1042_v16  ;;  %v2162_v10 = vpack.c.bf16 %v1558_v9, %v1557_v8 }
 0x82b   :  { %2089 = vmatprep.subr.mxu0 %v2280_v46 }
 0x82c   :  { %v1029_v19 = vmul.f32 1.442695, %v1026_v18 }
 0x82d   :  { %v1118_v20 = vpop.permute.xlu1 %1117 }
 0x82e   :  { %2234 = vpow2.f32 %v1029_v19  ;;  %2085 = vmatpush3.msra.mxu1 %v1118_v20 }
 0x82f   :  { %2094 = vmatprep.subr.mxu1 %v2280_v46 }
 0x831   :  { %v1196_v29 = vpop.permute.xlu1 %1195 }
 0x834   :  { %v2233_v21 = vpop.eup %2232 }
 0x835   :  { %v1031_v22 = vsel %vm207_vm6, %v2233_v21, 0.0  ;;  %v1274_v33 = vpop.permute.xlu1 %1273 }
 0x836   :  { %1032 = vadd.xlane.f32.xlu0 %v1031_v22 }
 0x838   :  { %v2235_v23 = vpop.eup %2234 }
 0x839   :  { %v1034_v25 = vsel %vm207_vm6, %v2235_v23, 0.0  ;;  %v1272_v36 = vpop.permute.xlu1 %1271 }
 0x83a   :  { %1035 = vadd.xlane.f32.xlu0 %v1034_v25 }
 0x850   :  { %1193 = vrot.lane.b32.xlu0 %v2422_v51, %s2291_s21 }
 0x8c3   :  { %v1033_v27 = vpop.xlane.xlu0 %1032 }
 0x8c4   :  { %2236 = vrcp.f32 %v1033_v27 }
 0x8c7   :  { %v1036_v28 = vpop.xlane.xlu0 %1035 }
 0x8c8   :  { %2238 = vrcp.f32 %v1036_v28 }
 0x8cb   :  { %v1194_v35 = vpop.permute.xlu0 %1193 }
 0x8ce   :  { %v2237_v30 = vpop.eup %2236 }
 0x8cf   :  { %v1039_v31 = vmul.f32 %v2237_v30, %v2233_v21 }
 0x8d1   :  { %2082 = vmatmul.mubr.msk.f32.vlgmr.msra.gmra.mrb[8].mxu0 %vm207_vm6, %v1039_v31 }
 0x8d2   :  { %v2239_v32 = vpop.eup %2238  ;;  %2090 = vmatpush3.xpose.msk.msra.mxu0 %vm207_vm6, %v1196_v29  ;;  %2091 = vmatprep.mubr.msk.f32.mxu0 %vm2281_vm5, %v2280_v46  ;;  %v1947_v29 = vld [vmem:[%s2669_s7] ss:$0 sm:$0xff] }
 0x8d3   :  { %v1040_v34 = vmul.f32 %v2239_v32, %v2235_v23  ;;  %2099 = vmatprep.subr.mxu0 %v2280_v46 }
 0x8d5   :  { %2087 = vmatmul.mubr.msk.f32.vlgmr.msra.gmra.mrb[14].mxu1 %vm207_vm6, %v1040_v34  ;;  %2092 = vmatmul.mubr.msk.f32.vlgmr.msra.gmra.mrb[10].mxu0 %vm207_vm6, %v1194_v35 }
 0x8d6   :  { %2095 = vmatpush3.xpose.msk.msra.mxu1 %vm207_vm6, %v1274_v33  ;;  %2096 = vmatprep.mubr.msk.f32.mxu1 %vm2281_vm5, %v2280_v46 }
 0x8d7   :  { %2104 = vmatprep.subr.mxu1 %v2280_v46  ;;  %2101 = vmatprep.mubr.msk.f32.mxu0 %vm2281_vm5, %v2280_v46 }
 0x8d9   :  { %2097 = vmatmul.mubr.msk.f32.vlgmr.msra.gmra.mrb[16].mxu1 %vm207_vm6, %v1272_v36 }
 0x8da   :  { %2106 = vmatprep.mubr.msk.f32.mxu1 %vm2281_vm5, %v2280_v46 }
 0x9a4   :  { %v1113_v37 = vpop.f32.mrb[8].mxu0 }
 0x9a5   :  { %v2083_v38 = vpop.f32.mrb[9].mxu0 }
 0x9a8   :  { %v1189_v39 = vpop.f32.mrb[14].mxu1  ;;  %v1267_v40 = vpop.f32.mrb[10].mxu0 }
 0x9a9   :  { %v1268_v41 = vadd.f32 %v1267_v40, %v2441_v54  ;;  %v2088_v42 = vpop.f32.mrb[15].mxu1  ;;  %v2093_v43 = vpop.f32.mrb[11].mxu0 }
 0x9ab   :  { %v1349_v44 = vsel %vm207_vm6, %v1268_v41, -inf }
 0x9ac   :  { %1350 = vmax.xlane.f32.xlu0 %v1349_v44  ;;  %v1345_v45 = vpop.f32.mrb[16].mxu1  ;;  %v1707_v44 = vld [vmem:[%s2672_s10] sm:$0xff] }
 0x9ad   :  { %v1346_v47 = vadd.f32 %v1345_v45, %v2447_v58  ;;  %v2098_v48 = vpop.f32.mrb[17].mxu1  ;;  %v1708_v45 = vld [vmem:[%s2672_s10 + $0x8] sm:$0xff] }
 0x9ae   :  { %v2166_v48 = vpack.c.bf16 %v1708_v45, %v1707_v44 }
 0x9af   :  { %v1352_v50 = vsel %vm207_vm6, %v1346_v47, -inf }
 0x9b0   :  { %1353 = vmax.xlane.f32.xlu1 %v1352_v50  ;;  %v1710_v50 = vld [vmem:[%s2672_s10 + $0x18] sm:$0xff] }
 0x9c1   :  { %1447 = vrot.lane.b32.xlu1 %v2420_v49, %s2292_s22 }
 0x9c5   :  { %1525 = vrot.lane.b32.xlu1 %v2512_v63, %s2293_s23 }
 0x9c9   :  { %1527 = vrot.lane.b32.xlu1 %v2514_v3, %s2293_s23 }
 0x9cd   :  { %1535 = vrot.lane.b32.xlu1 %v1189_v39, %s2294_s4 }
 0xa39   :  { %v1351_v46 = vpop.xlane.xlu0 %1350 }
 0xa3a   :  { %v1355_v54 = vsub.f32 %v1268_v41, %v1351_v46 }
 0xa3c   :  { %v1357_v52 = vmul.f32 1.442695, %v1355_v54  ;;  %v1801_v54 = vld [vmem:[%s2674_s12] sm:$0xff] }
 0xa3d   :  { %v1354_v58 = vpop.xlane.xlu1 %1353 }
 0xa3e   :  { %2240 = vpow2.f32 %v1357_v52  ;;  %v1356_v53 = vsub.f32 %v1346_v47, %v1354_v58  ;;  %v1709_v47 = vld [vmem:[%s2672_s10 + $0x10] sm:$0xff]  ;;  %v1802_v52 = vld [vmem:[%s2674_s12 + $0x8] sm:$0xff] }
 0xa3f   :  { %v2170_v46 = vpack.c.bf16 %v1710_v50, %v1709_v47  ;;  %v1803_v58 = vld [vmem:[%s2674_s12 + $0x10] sm:$0xff] }
 0xa40   :  { %v1359_v55 = vmul.f32 1.442695, %v1356_v53  ;;  %v2174_v53 = vpack.c.bf16 %v1802_v52, %v1801_v54 }
 0xa41   :  { %v1448_v56 = vpop.permute.xlu1 %1447 }
 0xa42   :  { %2242 = vpow2.f32 %v1359_v55  ;;  %2105 = vmatpush3.msra.mxu1 %v1448_v56  ;;  %v1804_v55 = vld [vmem:[%s2674_s12 + $0x18] sm:$0xff] }
 0xa43   :  { %2167 = vmatprep.subr.bf16.mxu1 %v2166_v48  ;;  %v2178_v56 = vpack.c.bf16 %v1804_v55, %v1803_v58 }
 0xa45   :  { %v1526_v15 = vpop.permute.xlu1 %1525 }
 0xa46   :  { %v1547_v18 = vsel %vm207_vm6, %v2478_v24, %v1526_v15 }
 0xa48   :  { %v2241_v49 = vpop.eup %2240 }
 0xa49   :  { %v1361_v57 = vsel %vm207_vm6, %v2241_v49, 0.0  ;;  %v1528_v16 = vpop.permute.xlu1 %1527 }
 0xa4a   :  { %1362 = vadd.xlane.f32.xlu0 %v1361_v57  ;;  %v1548_v23 = vsel %vm207_vm6, %v2480_v26, %v1528_v16  ;;  %v1806_v57 = vld [vmem:[%s2674_s12 + $0x28] sm:$0xff]  ;;  %v1951_v16 = vld [vmem:[%s2671_s9] ss:$0 sm:$0xff] }
 0xa4c   :  { %v2243_v59 = vpop.eup %2242 }
 0xa4d   :  { %v1364_v60 = vsel %vm207_vm6, %v2243_v59, 0.0  ;;  %v1536_v19 = vpop.permute.xlu1 %1535 }
 0xa4e   :  { %1365 = vadd.xlane.f32.xlu0 %v1364_v60  ;;  %v1551_v25 = vsel %vm1549_vm8, %v1548_v23, %v1536_v19  ;;  %v1807_v23 = vld [vmem:[%s2674_s12 + $0x30] sm:$0xff] }
 0xa64   :  { %1371 = vrot.lane.b32.xlu0 %v2422_v51, %s2292_s22  ;;  %v1556_v51 = vld [vmem:[%s2668_s6 + $0x8] sm:$0xff] }
 0xa65   :  { %v2158_v7 = vpack.c.bf16 %v1556_v51, %v1555_v6 }
 0xa68   :  { %1533 = vrot.lane.b32.xlu0 %v1113_v37, %s2294_s4 }
 0xad7   :  { %v1363_v61 = vpop.xlane.xlu0 %1362 }
 0xad8   :  { %2244 = vrcp.f32 %v1363_v61 }
 0xadb   :  { %v1366_v62 = vpop.xlane.xlu0 %1365 }
 0xadc   :  { %2246 = vrcp.f32 %v1366_v62 }
 0xadf   :  { %v1372_v63 = vpop.permute.xlu0 %1371 }
 0xae0   :  { %2100 = vmatpush3.msra.mxu0 %v1372_v63 }
 0xae1   :  { %2159 = vmatprep.subr.bf16.mxu0 %v2158_v7 }
 0xae2   :  { %v2245_v2 = vpop.eup %2244 }
 0xae3   :  { %v1369_v3 = vmul.f32 %v2245_v2, %v2241_v49  ;;  %v1534_v17 = vpop.permute.xlu0 %1533  ;;  %v1805_v49 = vld [vmem:[%s2674_s12 + $0x20] sm:$0xff] }
 0xae4   :  { %v1550_v20 = vsel %vm1549_vm8, %v1547_v18, %v1534_v17 }
 0xae5   :  { %2102 = vmatmul.mubr.msk.f32.vlgmr.msra.gmra.mrb[12].mxu0 %vm207_vm6, %v1369_v3 }
 0xae6   :  { %v2247_v4 = vpop.eup %2246  ;;  %2161 = vmatpush3.bf16.msra.mxu0 %v2158_v7 }
 0xae7   :  { %v1370_v5 = vmul.f32 %v2247_v4, %v2243_v59  ;;  %2163 = vmatprep.subr.bf16.mxu0 %v2162_v10  ;;  %v2182_v59 = vpack.c.bf16 %v1806_v57, %v1805_v49 }
 0xae9   :  { %2107 = vmatmul.mubr.msk.f32.vlgmr.msra.gmra.mrb[18].mxu1 %vm207_vm6, %v1370_v5 }
 0xaea   :  { %2165 = vmatpush3.bf16.msra.mxu0 %v2162_v10  ;;  %2169 = vmatpush3.bf16.msra.mxu1 %v2166_v48 }
 0xaeb   :  { %2171 = vmatprep.subr.bf16.mxu1 %v2170_v46  ;;  %2175 = vmatprep.subr.bf16.mxu0 %v2174_v53 }
 0xaee   :  { %2173 = vmatpush3.bf16.msra.mxu1 %v2170_v46 }
 0xbb8   :  { %v1443_v11 = vpop.f32.mrb[12].mxu0 }
 0xbb9   :  { %1541 = vrot.lane.b32.xlu0 %v1443_v11, %s2295_s29  ;;  %v2103_v12 = vpop.f32.mrb[13].mxu0 }
 0xbbc   :  { %v1519_v13 = vpop.f32.mrb[18].mxu1 }
 0xbbd   :  { %1543 = vrot.lane.b32.xlu1 %v1519_v13, %s2295_s29  ;;  %v2108_v14 = vpop.f32.mrb[19].mxu1  ;;  %v1950_v13 = vld [vmem:[%s2670_s8] ss:$0 sm:$0xff] }
 0xc2b   :  { %v1542_v21 = vpop.permute.xlu0 %1541 }
 0xc2c   :  { %v1553_v22 = vsel %vm1552_vm7, %v1550_v20, %v1542_v21 }
 0xc2d   :  { %2117 = vmatprep.mubr.msk.f32.mxu0 %vm54_vm0, %v1553_v22 }
 0xc2f   :  { %v1544_v27 = vpop.permute.xlu1 %1543 }
 0xc30   :  { %v1554_v28 = vsel %vm1552_vm7, %v1551_v25, %v1544_v27  ;;  %v1808_v25 = vld [vmem:[%s2674_s12 + $0x38] sm:$0xff]  ;;  %s2296_s12 = smov [#allocation2]  }
 0xc31   :  { %2118 = vmatmul.mubr.msk.f32.vlgmr.msra.gmra.mrb[14].mxu0 %vm54_vm0, %v1554_v28  ;;  %v2186_v27 = vpack.c.bf16 %v1808_v25, %v1807_v23  ;;  %v1952_v28 = vld [vmem:[%s2673_s11] ss:$0 sm:$0xff]  ;;  %s1907_s18 = sshll.u32 %s2296_s12, 4  ;;  %s1908_s18 = int_to_ptr.vmem [resolvable:$true] %s1907_s18 }
 0xc32   :  { %2177 = vmatpush3.bf16.msra.mxu0 %v2174_v53  ;;  %s2256_s11 = scalar_lea.vmem %s1908_s18, 256  ;;  %p2261_p1 = scmp.lt.s32.totalorder %s1908_s18, %s1908_s18 }
 0xc33   :  { %2179 = vmatprep.subr.bf16.mxu0 %v2178_v56  ;;  %p2257_p0 = scmp.ne.s32.totalorder %s1908_s18, %s2256_s11  ;;  %p2262_p2 = scmp.lt.s32.totalorder %s2256_s11, %s2256_s11 }
 0xc35   :  { %p2263_p3 = por %p2262_p2, %p2261_p1 }
 0xc36   :  { %2181 = vmatpush3.bf16.msra.mxu0 %v2178_v56 }
 0xc37   :  { %2183 = vmatprep.subr.bf16.mxu0 %v2182_v59  ;;  %p2264_p4 = pnand %p2263_p3, %p2257_p0 }
 0xc3a   :  { %2185 = vmatpush3.bf16.msra.mxu0 %v2182_v59 }
 0xc3b   :  { %2187 = vmatprep.subr.bf16.mxu0 %v2186_v27 }
 0xc3e   :  { %2189 = vmatpush3.bf16.msra.mxu0 %v2186_v27 }
 0xd04   :  { %v2119_v24 = vpop.f32.mrb[14].mxu0 }
 0xd05   :  { %v1644_v30 = vadd.f32 %v2119_v24, %v1947_v29  ;;  %v1638_v31 = vpop.f32.mrb[15].mxu0 }
 0xd06   :  { %v1639_v32 = vadd.f32 %v1947_v29, %v1638_v31 }
 0xd07   :  { %v2582_v33 = vadd.f32 %v1644_v30, %v2381_v1 }
 0xd08   :  { %v2585_v34 = vadd.f32 %v1639_v32, %v2376_v0 }
 0xd09   :  { %v1654_v26 = vsel %vm54_vm0, %v2582_v33, 0.0 }
 0xd0a   :  { %1655 = vadd.xlane.f32.xlu1 %v1654_v26  ;;  %v1651_v35 = vsel %vm54_vm0, %v2585_v34, 0.0 }
 0xd0b   :  { %1652 = vadd.xlane.f32.xlu0 %v1651_v35  ;;  %v1955_v35 = vld [vmem:[%s2675_s13] ss:$0 sm:$0xff] }
 0xd97   :  { %v1656_v36 = vpop.xlane.xlu1 %1655 }
 0xd98   :  { %v1658_v37 = vmul.f32 0.03125, %v1656_v36  ;;  %v1653_v38 = vpop.xlane.xlu0 %1652 }
 0xd99   :  { %v1657_v39 = vmul.f32 0.03125, %v1653_v38 }
 0xd9a   :  { %v1660_v40 = vsub.f32 %v2582_v33, %v1658_v37 }
 0xd9b   :  { %v1659_v1 = vsub.f32 %v2585_v34, %v1657_v39 }
 0xd9c   :  { %v1662_v42 = vmul.f32 %v1660_v40, %v1660_v40  ;;  %v1696_v18 = vmul.f32 %v1950_v13, %v1660_v40 }
 0xd9d   :  { %v1661_v41 = vmul.f32 %v1659_v1, %v1659_v1  ;;  %v1695_v14 = vmul.f32 %v1950_v13, %v1659_v1 }
 0xd9e   :  { %v1666_v43 = vsel %vm54_vm0, %v1662_v42, 0.0 }
 0xd9f   :  { %v1663_v0 = vsel %vm54_vm0, %v1661_v41, 0.0 }
 0xda0   :  { %1664 = vadd.xlane.f32.xlu0 %v1663_v0 }
 0xda4   :  { %1667 = vadd.xlane.f32.xlu0 %v1666_v43 }
 0xe2d   :  { %v1665_v60 = vpop.xlane.xlu0 %1664 }
 0xe2e   :  { %v1669_v61 = vmul.f32 0.032258064, %v1665_v60 }
 0xe30   :  { %2248 = vrsqrt.f32 %v1669_v61  ;;  %vm1673_vm9 = vcmp.eq.f32.partialorder %v1669_v61, inf  ;;  %v1676_v4 = vand.u32 2147483648, %v1669_v61  ;;  %vm1675_vm10 = vcmp.eq.f32.partialorder %v1669_v61, 0.0 }
 0xe31   :  { %v1668_v62 = vpop.xlane.xlu0 %1667 }
 0xe32   :  { %v1670_v63 = vmul.f32 0.032258064, %v1668_v62 }
 0xe34   :  { %2250 = vrsqrt.f32 %v1670_v63  ;;  %vm1680_vm11 = vcmp.eq.f32.partialorder %v1670_v63, inf  ;;  %v1683_v9 = vand.u32 2147483648, %v1670_v63  ;;  %vm1682_vm12 = vcmp.eq.f32.partialorder %v1670_v63, 0.0 }
 0xe3a   :  { %v2249_v2 = vpop.eup %2248 }
 0xe3b   :  { %v1672_v3 = vmul.f32 %v2249_v2, %v1669_v61 }
 0xe3d   :  { %v1674_v5 = vsel %vm1673_vm9, %v1669_v61, %v1672_v3 }
 0xe3e   :  { %v2251_v6 = vpop.eup %2250  ;;  %v1677_v51 = vsel %vm1675_vm10, %v1676_v4, %v1674_v5 }
 0xe3f   :  { %v1679_v7 = vmul.f32 %v2251_v6, %v1670_v63  ;;  %v1685_v8 = vadd.f32 1e-06, %v1677_v51 }
 0xe41   :  { %v1681_v10 = vsel %vm1680_vm11, %v1670_v63, %v1679_v7  ;;  %2252 = vrcp.f32 %v1685_v8 }
 0xe42   :  { %v1684_v11 = vsel %vm1682_vm12, %v1683_v9, %v1681_v10 }
 0xe43   :  { %v1686_v12 = vadd.f32 1e-06, %v1684_v11 }
 0xe45   :  { %2254 = vrcp.f32 %v1686_v12 }
 0xe4b   :  { %v2253_v15 = vpop.eup %2252 }
 0xe4c   :  { %v1697_v17 = vmul.f32 %v2253_v15, %v1695_v14 }
 0xe4e   :  { %v1705_v19 = vadd.f32 %v1951_v16, %v1697_v17 }
 0xe4f   :  { %v2255_v20 = vpop.eup %2254 }
 0xe50   :  { %v1698_v21 = vmul.f32 %v2255_v20, %v1696_v18  ;;  %2128 = vmatprep.mubr.msk.f32.mxu1 %vm54_vm0, %v1705_v19 }
 0xe52   :  { %v1706_v22 = vadd.f32 %v1951_v16, %v1698_v21 }
 0xe54   :  { %2129 = vmatmul.mubr.msk.f32.vlgmr.msra.gmra.mrb[20].mxu1 %vm54_vm0, %v1706_v22 }
 0xf27   :  { %v2130_v29 = vpop.f32.mrb[20].mxu1 }
 0xf28   :  { %v1796_v24 = vadd.f32 %v2130_v29, %v1952_v28  ;;  %v1790_v30 = vpop.f32.mrb[21].mxu1 }
 0xf29   :  { %v1791_v31 = vadd.f32 %v1952_v28, %v1790_v30 }
 0xf2a   :  { %v1800_v26 = vmax.f32 %v1796_v24, 0.0 }
 0xf2b   :  { %v1799_v32 = vmax.f32 %v1791_v31, 0.0 }
 0xf2d   :  { %2147 = vmatprep.mubr.msk.f32.mxu0 %vm1816_vm13, %v1799_v32 }
 0xf2e   :  { %2148 = vmatmul.mubr.msk.f32.vlgmr.msra.gmra.mrb[16].mxu0 %vm1816_vm13, %v1800_v26 }
0x1001   :  { %v2149_v36 = vpop.f32.mrb[16].mxu0 }
0x1002   :  { %v1895_v37 = vadd.f32 %v2149_v36, %v1955_v35  ;;  %v1889_v38 = vpop.f32.mrb[17].mxu0 }
0x1003   :  { %v1890_v39 = vadd.f32 %v1955_v35, %v1889_v38 }
0x1004   :  { %v1899_v40 = vadd.f32 %v1895_v37, %v2582_v33 }
0x1005   :  { %v1898_v1 = vadd.f32 %v1890_v39, %v2585_v34 }
0x1006   :  { %1901 = vst.msk [vmem:[#allocation2 + $0x8] sm:$0xff] %vm54_vm0, %v1899_v40 }
0x1007   :  { %1900 = vst.msk [vmem:[#allocation2] sm:$0xff] %vm54_vm0, %v1898_v1 }
0x1008   :  { %2267 = shalt.err (!%p2264_p4)
}
0x1009   :  { %s2268_s20 = scalar_lea.hbm %s2676_s14, 256 }
0x100a   :  { %p2269_p5 = scmp.ne.s32.totalorder %s2676_s14, %s2268_s20  ;;  %p2272_p6 = scmp.lt.u32.totalorder %s2268_s20, %s2676_s14 }
0x100c   :  { %p2274_p7 = pnand %p2272_p6, %p2269_p5 }
0x100e   :  { %2277 = shalt.err (!%p2274_p7)
}
0x100f   :  { %s2297_s25 = smov 128  }
0x1010   :  { %1913 = dma.vmem_to_hbm [thread:$0]  %s1908_s18, 256, %s2676_s14, [#allocation3], %s2297_s25, %s2297_s25, %s2293_s23  }
0x1011   :  { %2278 = dma.done.wait [#allocation3], 256  }
0x1012   :  { %2279 = vsyncadd [#allocation3], 4294967040 }
0x1013   :  { %1917 = vsyncpa [#allocation3], 1 }

</bundles_post_ra>
